<compile_context>
chip_gen: v7x
topology: tpu7x:2x2x1
jax: 0.10.0
libtpu: 0.0.40
codegen_flags: <defaults>
</compile_context>

<pallas_src>
import jax
import jax.numpy as jnp
from jax import lax
from jax.experimental import pallas as pl
from jax.experimental.pallas import tpu as pltpu


_BIG = 1e30          # "infinite" squared distance (finite -> no NaN/Inf arithmetic)
_BIG_IDX = 2 ** 30   # index placeholder that can never match a real row


def _round_up(x, m):
    return (x + m - 1) // m * m


def _chunk_sqdist(x2c, x1):
    """Squared distances between chunk rows and tile columns, on the VPU.

    x2c: [SC, C] f32, x1: [C, TN] f32  ->  [SC, TN] f32 (>= 0 by construction).
    """
    C = x1.shape[0]
    d = None
    for c in range(C):                                    # static unroll, C tiny
        diff = x2c[:, c:c + 1] - x1[c:c + 1, :]
        d = diff * diff if d is None else d + diff * diff
    return d


def _topk3_insert(state, dchunk, rowg):
    """Merge one chunk of squared distances into a running sorted top-3.

    state  = (d1, i1, d2, i2, d3, i3), each [1, TN], distances ascending.
    dchunk = [SC, TN] squared distances (padded rows hold _BIG).
    rowg   = [SC, TN] int32 global row index of every chunk row.
    """
    d1, i1, d2, i2, d3, i3 = state
    cur = dchunk
    for _ in range(3):                                    # static unroll
        cmin = jnp.min(cur, axis=0, keepdims=True)        # [1, TN]  (XLU)
        is_min = cur <= cmin
        cidx = jnp.min(jnp.where(is_min, rowg, _BIG_IDX),
                       axis=0, keepdims=True)             # first occurrence
        # Insert (cmin, cidx) into the sorted running triple.
        lt1 = cmin < d1
        lt2 = cmin < d2
        lt3 = cmin < d3
        d1n = jnp.where(lt1, cmin, d1)
        i1n = jnp.where(lt1, cidx, i1)
        d2n = jnp.where(lt1, d1, jnp.where(lt2, cmin, d2))
        i2n = jnp.where(lt1, i1, jnp.where(lt2, cidx, i2))
        d3n = jnp.where(lt2, d2, jnp.where(lt3, cmin, d3))
        i3n = jnp.where(lt2, i2, jnp.where(lt3, cidx, i3))
        d1, i1, d2, i2, d3, i3 = d1n, i1n, d2n, i2n, d3n, i3n
        # Knock the selected row out so the next pick finds a different one.
        cur = jnp.where(rowg == cidx, _BIG, cur)
    return d1, i1, d2, i2, d3, i3


def _onehot_weights(rowg, ia, wa, ib, wb, ic, wc):
    """Sparse [SC, TN] interpolation-weight matrix for one chunk of rows."""
    oh = jnp.where(rowg == ia, wa, 0.0)
    oh = oh + jnp.where(rowg == ib, wb, 0.0)
    oh = oh + jnp.where(rowg == ic, wc, 0.0)
    return oh


# ---------------------------------------------------------------------------
# Fused kernel factory. Per-grid-point refs (channels-first, batch squeezed):
#   xyz1_ref [C, TN], xyz2_ref [S_pad, C], pts2_ref [D2, S_pad],
#   p1_ref [D1, TN] (optional), w1i_ref [C1, D2], w1p_ref [C1, D1] (optional),
#   b1_ref [C1, 1], (wk_ref [Ck, Ck-1], bk_ref [Ck, 1]) per extra layer,
#   out_ref [C_last, TN].
# ---------------------------------------------------------------------------
def _make_fused_kernel(C, S, TN, SC, num_chunks, num_extra_layers,
                       has_points1, skip_interp, compute_dtype):
    def kernel(*refs):
        it = iter(refs)
        xyz1_ref = next(it)
        xyz2_ref = next(it)
        pts2_ref = next(it)
        p1_ref = next(it) if has_points1 else None
        w1i_ref = next(it)
        w1p_ref = next(it) if has_points1 else None
        b1_ref = next(it)
        extra = [(next(it), next(it)) for _ in range(num_extra_layers)]
        out_ref = next(it)

        D2 = pts2_ref.shape[0]

        if skip_interp:
            # S == 1: PyTorch repeats the single sampled point's features.
            interp = jnp.broadcast_to(pts2_ref[...].astype(jnp.float32),
                                      (D2, TN))
        else:
            x1 = xyz1_ref[...].astype(jnp.float32)                 # [C, TN]

            init = (jnp.full((1, TN), _BIG, jnp.float32),
                    jnp.full((1, TN), -1, jnp.int32),
                    jnp.full((1, TN), _BIG, jnp.float32),
                    jnp.full((1, TN), -1, jnp.int32),
                    jnp.full((1, TN), _BIG, jnp.float32),
                    jnp.full((1, TN), -1, jnp.int32))

            # ---- pass 1: streaming top-3 over the sampled points ----------
            if num_chunks == 1:
                x2 = xyz2_ref[...].astype(jnp.float32)             # [S, C]
                rowg = lax.broadcasted_iota(jnp.int32, (S, TN), 0)
                d = _chunk_sqdist(x2, x1)
                state = _topk3_insert(init, d, rowg)
            else:
                def pass1(c, st):
                    off = pl.multiple_of(c * SC, SC)
                    x2c = xyz2_ref[pl.ds(off, SC), :].astype(jnp.float32)
                    rowg = lax.broadcasted_iota(jnp.int32, (SC, TN), 0) + c * SC
                    d = _chunk_sqdist(x2c, x1)
                    d = jnp.where(rowg < S, d, _BIG)               # mask S-padding
                    return _topk3_insert(st, d, rowg)
                state = lax.fori_loop(0, num_chunks, pass1, init)

            da, ia, db, ib, dc, ic = state
            # Inverse-distance weights; normalization folded in *before* the
            # matmul so the bf16 interpolation matmul only sees values in [0,1].
            ra = pl.reciprocal(da + 1e-8, approx=True)
            rb = pl.reciprocal(db + 1e-8, approx=True)
            rc = pl.reciprocal(dc + 1e-8, approx=True)
            inv_norm = pl.reciprocal(ra + rb + rc, approx=True)
            wa = ra * inv_norm
            wb = rb * inv_norm
            wc = rc * inv_norm

            # ---- pass 2: interpolation as sparse one-hot matmul ------------
            if num_chunks == 1:
                rowg = lax.broadcasted_iota(jnp.int32, (S, TN), 0)
                oh = _onehot_weights(rowg, ia, wa, ib, wb, ic, wc)
                interp = jnp.dot(pts2_ref[...].astype(compute_dtype),
                                 oh.astype(compute_dtype),
                                 preferred_element_type=jnp.float32)
            else:
                def pass2(c, acc):
                    off = pl.multiple_of(c * SC, SC)
                    rowg = lax.broadcasted_iota(jnp.int32, (SC, TN), 0) + c * SC
                    oh = _onehot_weights(rowg, ia, wa, ib, wb, ic, wc)
                    p2c = pts2_ref[:, pl.ds(off, SC)]
                    return acc + jnp.dot(p2c.astype(compute_dtype),
                                         oh.astype(compute_dtype),
                                         preferred_element_type=jnp.float32)
                interp = lax.fori_loop(0, num_chunks, pass2,
                                       jnp.zeros((D2, TN), jnp.float32))

        # ---- fused 1x1-conv (+folded BN) + ReLU MLP: bf16 MXU, f32 accum ---
        # concat([points1, interp]) realised as split first-layer weights.
        y = jnp.dot(w1i_ref[...], interp.astype(compute_dtype),
                    preferred_element_type=jnp.float32)
        if has_points1:
            y = y + jnp.dot(w1p_ref[...], p1_ref[...].astype(compute_dtype),
                            preferred_element_type=jnp.float32)
        y = jnp.maximum(y + b1_ref[...].astype(jnp.float32), 0.0)

        for wk_ref, bk_ref in extra:
            y = jnp.dot(wk_ref[...], y.astype(compute_dtype),
                        preferred_element_type=jnp.float32)
            y = jnp.maximum(y + bk_ref[...].astype(jnp.float32), 0.0)

        out_ref[...] = y.astype(out_ref.dtype)

    return kernel


# ---------------------------------------------------------------------------
# Wrapper reproducing PointNetFeaturePropagation.forward
# ---------------------------------------------------------------------------
def pointnet_fp_forward(xyz1, xyz2, points1, points2, folded_params,
                        compute_dtype=jnp.bfloat16, out_dtype=jnp.float32,
                        tile_n=None, vmem_limit_bytes=48 << 20):
    """
    xyz1:   [B, C, N]
    xyz2:   [B, C, S]
    points1:[B, D1, N] or None
    points2:[B, D2, S]
    folded_params: list of (W [Cout, Cin], b [Cout, 1]) with BN folded in.
    returns [B, D', N]  (out_dtype, default float32)
    """
    B, C, N = xyz1.shape
    S = xyz2.shape[2]
    D2 = points2.shape[1]
    has_points1 = points1 is not None
    D1 = points1.shape[1] if has_points1 else 0
    skip_interp = (S == 1)
    c_last = folded_params[-1][0].shape[0]
    max_ch = max(w.shape[0] for w, _ in folded_params)

    # Only the small xyz2 tensor is transposed. xyz1 / points1 / points2 are
    # passed in their native dtype & layout (casting happens per-tile in VMEM).
    xyz2_t = jnp.transpose(xyz2, (0, 2, 1))                    # [B, S, C]
    pts2 = points2                                             # [B, D2, S]

    # Chunking over S: bounds in-kernel VMEM use independent of S.
    SC_MAX = 256
    if skip_interp or S <= SC_MAX:
        S_pad, SC, num_chunks = S, max(S, 1), 1
    else:
        SC = SC_MAX
        S_pad = _round_up(S, SC)
        num_chunks = S_pad // SC
        if S_pad != S:                                         # tiny pads only
            xyz2_t = jnp.pad(xyz2_t, ((0, 0), (0, S_pad - S), (0, 0)))
            pts2 = jnp.pad(pts2, ((0, 0), (0, 0), (0, S_pad - S)))

    # Lane-tile size: biggest TN whose per-step working set fits well inside
    # the scoped-VMEM budget (v7x only has 64 MiB physical VMEM).
    if tile_n is None:
        w_itemsize = jnp.dtype(compute_dtype).itemsize
        w_bytes = 2 * sum(w.size * w_itemsize + b.size * 4     # double-buffered
                          for w, b in folded_params)
        per_n = 4 * (2 * (C + D1 + c_last)                     # io tiles (x2 buf)
                     + 6 * SC                                  # chunk temporaries
                     + D2 + 2 * max_ch + 16)                   # interp + activations
        budget = int(0.75 * vmem_limit_bytes) - w_bytes
        tile_n = 256
        for cand in (2048, 1024, 512, 256):
            if per_n * cand <= budget:
                tile_n = cand
                break

    if N <= 128:
        TN = N                                                 # single full tile
    else:
        TN = max(128, min(tile_n, _round_up(N, 128)))          # lane-dense stores
    num_tiles = (N + TN - 1) // TN     # ragged last tile handled by Pallas masking

    # Split the first-layer weight over the concat([points1, interp]) input,
    # cast all MLP weights to the MXU compute dtype (biases stay f32).
    w1, b1 = folded_params[0]
    if has_points1:
        w1p = w1[:, :D1].astype(compute_dtype)
        w1i = w1[:, D1:].astype(compute_dtype)
    else:
        w1p = None
        w1i = w1.astype(compute_dtype)
    b1 = b1.astype(jnp.float32)
    extra = [(w.astype(compute_dtype), b.astype(jnp.float32))
             for (w, b) in folded_params[1:]]

    # Assemble inputs / specs in kernel-argument order.
    inputs = [xyz1, xyz2_t, pts2]
    in_specs = [
        pl.BlockSpec((None, C, TN), lambda b, j: (b, 0, j)),
        pl.BlockSpec((None, S_pad, C), lambda b, j: (b, 0, 0)),
        pl.BlockSpec((None, D2, S_pad), lambda b, j: (b, 0, 0)),
    ]
    if has_points1:
        inputs.append(points1)
        in_specs.append(pl.BlockSpec((None, D1, TN), lambda b, j: (b, 0, j)))
    inputs.append(w1i)
    in_specs.append(pl.BlockSpec(w1i.shape, lambda b, j: (0, 0)))
    if has_points1:
        inputs.append(w1p)
        in_specs.append(pl.BlockSpec(w1p.shape, lambda b, j: (0, 0)))
    inputs.append(b1)
    in_specs.append(pl.BlockSpec(b1.shape, lambda b, j: (0, 0)))
    for (wk, bk) in extra:
        inputs.append(wk)
        in_specs.append(pl.BlockSpec(wk.shape, lambda b, j: (0, 0)))
        inputs.append(bk)
        in_specs.append(pl.BlockSpec(bk.shape, lambda b, j: (0, 0)))

    kernel = _make_fused_kernel(C, S, TN, SC, num_chunks, len(extra),
                                has_points1, skip_interp, compute_dtype)

    out = pl.pallas_call(
        kernel,
        out_shape=jax.ShapeDtypeStruct((B, c_last, N), out_dtype),
        grid=(B, num_tiles),
        in_specs=in_specs,
        out_specs=pl.BlockSpec((None, c_last, TN), lambda b, j: (b, 0, j)),
        compiler_params=pltpu.CompilerParams(
            dimension_semantics=("parallel", "parallel"),
            vmem_limit_bytes=vmem_limit_bytes),
    )(*inputs)
    return out


def make_folded_params(keys, in_channel, mlp_channels):
    """Deterministic Conv1d + BatchNorm1d params, BN folded (eval mode).

    Returns weights in conv layout [Cout, Cin] and biases as [Cout, 1],
    ready for the channels-first kernel (W @ x)."""
    params = []
    last = in_channel
    ki = 0
    for out_ch in mlp_channels:
        w = 0.1 * jax.random.normal(keys[ki], (out_ch, last), jnp.float32); ki += 1
        bias = 0.1 * jax.random.normal(keys[ki], (out_ch,), jnp.float32); ki += 1
        gamma = 1.0 + 0.1 * jax.random.normal(keys[ki], (out_ch,), jnp.float32); ki += 1
        beta = 0.1 * jax.random.normal(keys[ki], (out_ch,), jnp.float32); ki += 1
        mean = 0.1 * jax.random.normal(keys[ki], (out_ch,), jnp.float32); ki += 1
        var = 0.5 + jnp.abs(jax.random.normal(keys[ki], (out_ch,), jnp.float32)); ki += 1
        scale = gamma / jnp.sqrt(var + 1e-5)               # BatchNorm1d eps
        w_fold = w * scale[:, None]                        # [Cout, Cin]
        b_fold = ((bias - mean) * scale + beta)[:, None]   # [Cout, 1]
        params.append((w_fold, b_fold))
        last = out_ch
    return params


if __name__ == "__main__":
    key = jax.random.PRNGKey(0)
    B, C, N, S = 2, 3, 16, 8
    D1, D2 = 4, 6
    mlp_channels = [32, 16]
    in_channel = D1 + D2

    ks = jax.random.split(key, 4 + 6 * len(mlp_channels))
    xyz1 = jax.random.normal(ks[0], (B, C, N), jnp.float32)
    xyz2 = jax.random.normal(ks[1], (B, C, S), jnp.float32)
    points1 = jax.random.normal(ks[2], (B, D1, N), jnp.float32)
    points2 = jax.random.normal(ks[3], (B, D2, S), jnp.float32)

    folded_params = make_folded_params(ks[4:], in_channel, mlp_channels)

    out = pointnet_fp_forward(xyz1, xyz2, points1, points2, folded_params)
    out = jax.block_until_ready(out)
    assert out.shape == (B, mlp_channels[-1], N)
    assert out.dtype == jnp.float32
    assert bool(jnp.all(jnp.isfinite(out)))
    print("KERNEL_OK")
</pallas_src>

<mosaic_0001>
module attributes {stable_mosaic.version = 11 : i64} {
  func.func @kernel(%arg0: i32, %arg1: i32, %arg2: memref<1x3x16xf32, #tpu.memory_space<vmem>>, %arg3: memref<1x8x3xf32, #tpu.memory_space<vmem>>, %arg4: memref<1x6x8xf32, #tpu.memory_space<vmem>>, %arg5: memref<1x4x16xf32, #tpu.memory_space<vmem>>, %arg6: memref<32x6xbf16, #tpu.memory_space<vmem>>, %arg7: memref<32x4xbf16, #tpu.memory_space<vmem>>, %arg8: memref<32x1xf32, #tpu.memory_space<vmem>>, %arg9: memref<16x32xbf16, #tpu.memory_space<vmem>>, %arg10: memref<16x1xf32, #tpu.memory_space<vmem>>, %arg11: memref<1x16x16xf32, #tpu.memory_space<vmem>>) attributes {dimension_semantics = [#tpu.dimension_semantics<parallel>, #tpu.dimension_semantics<parallel>], iteration_bounds = array<i64: 2, 1>, scalar_prefetch = 0 : i64, scratch_operands = 0 : i64, tpu.core_type = #tpu.core_type<tc>, window_params = [{transform_indices = @transform_0, window_bounds = array<i64: 1, 3, 16>}, {transform_indices = @transform_1, window_bounds = array<i64: 1, 8, 3>}, {transform_indices = @transform_2, window_bounds = array<i64: 1, 6, 8>}, {transform_indices = @transform_3, window_bounds = array<i64: 1, 4, 16>}, {pipeline_mode = #tpu.pipeline_mode<synchronous>, transform_indices = @transform_4, window_bounds = array<i64: 32, 6>}, {pipeline_mode = #tpu.pipeline_mode<synchronous>, transform_indices = @transform_5, window_bounds = array<i64: 32, 4>}, {pipeline_mode = #tpu.pipeline_mode<synchronous>, transform_indices = @transform_6, window_bounds = array<i64: 32, 1>}, {pipeline_mode = #tpu.pipeline_mode<synchronous>, transform_indices = @transform_7, window_bounds = array<i64: 16, 32>}, {pipeline_mode = #tpu.pipeline_mode<synchronous>, transform_indices = @transform_8, window_bounds = array<i64: 16, 1>}, {transform_indices = @transform_9, window_bounds = array<i64: 1, 16, 16>}]} {
    %c0 = arith.constant 0 : index
    %c0_0 = arith.constant 0 : index
    %c0_1 = arith.constant 0 : index
    %0 = vector.load %arg2[%c0, %c0_0, %c0_1] : memref<1x3x16xf32, #tpu.memory_space<vmem>>, vector<1x3x16xf32>
    %1 = vector.shape_cast %0 : vector<1x3x16xf32> to vector<3x16xf32>
    %cst = arith.constant 1.000000e+30 : f32
    %2 = vector.broadcast %cst : f32 to vector<1x16xf32>
    %c-1_i32 = arith.constant -1 : i32
    %3 = vector.broadcast %c-1_i32 : i32 to vector<1x16xi32>
    %cst_2 = arith.constant 1.000000e+30 : f32
    %4 = vector.broadcast %cst_2 : f32 to vector<1x16xf32>
    %c-1_i32_3 = arith.constant -1 : i32
    %5 = vector.broadcast %c-1_i32_3 : i32 to vector<1x16xi32>
    %cst_4 = arith.constant 1.000000e+30 : f32
    %6 = vector.broadcast %cst_4 : f32 to vector<1x16xf32>
    %c-1_i32_5 = arith.constant -1 : i32
    %7 = vector.broadcast %c-1_i32_5 : i32 to vector<1x16xi32>
    %c0_6 = arith.constant 0 : index
    %c0_7 = arith.constant 0 : index
    %c0_8 = arith.constant 0 : index
    %8 = vector.load %arg3[%c0_6, %c0_7, %c0_8] : memref<1x8x3xf32, #tpu.memory_space<vmem>>, vector<1x8x3xf32>
    %9 = vector.shape_cast %8 : vector<1x8x3xf32> to vector<8x3xf32>
    %10 = tpu.iota {dimensions = array<i32: 0>} : vector<8x16xi32>
    %11 = vector.extract_strided_slice %9 {offsets = [0, 0], sizes = [8, 1], strides = [1, 1]} : vector<8x3xf32> to vector<8x1xf32>
    %12 = vector.extract_strided_slice %1 {offsets = [0, 0], sizes = [1, 16], strides = [1, 1]} : vector<3x16xf32> to vector<1x16xf32>
    %13 = vector.broadcast %11 : vector<8x1xf32> to vector<8x16xf32>
    %14 = vector.broadcast %12 : vector<1x16xf32> to vector<8x16xf32>
    %15 = arith.subf %13, %14 : vector<8x16xf32>
    %16 = arith.mulf %15, %15 : vector<8x16xf32>
    %17 = vector.extract_strided_slice %9 {offsets = [0, 1], sizes = [8, 1], strides = [1, 1]} : vector<8x3xf32> to vector<8x1xf32>
    %18 = vector.extract_strided_slice %1 {offsets = [1, 0], sizes = [1, 16], strides = [1, 1]} : vector<3x16xf32> to vector<1x16xf32>
    %19 = vector.broadcast %17 : vector<8x1xf32> to vector<8x16xf32>
    %20 = vector.broadcast %18 : vector<1x16xf32> to vector<8x16xf32>
    %21 = arith.subf %19, %20 : vector<8x16xf32>
    %22 = arith.mulf %21, %21 : vector<8x16xf32>
    %23 = arith.addf %16, %22 : vector<8x16xf32>
    %24 = vector.extract_strided_slice %9 {offsets = [0, 2], sizes = [8, 1], strides = [1, 1]} : vector<8x3xf32> to vector<8x1xf32>
    %25 = vector.extract_strided_slice %1 {offsets = [2, 0], sizes = [1, 16], strides = [1, 1]} : vector<3x16xf32> to vector<1x16xf32>
    %26 = vector.broadcast %24 : vector<8x1xf32> to vector<8x16xf32>
    %27 = vector.broadcast %25 : vector<1x16xf32> to vector<8x16xf32>
    %28 = arith.subf %26, %27 : vector<8x16xf32>
    %29 = arith.mulf %28, %28 : vector<8x16xf32>
    %30 = arith.addf %23, %29 : vector<8x16xf32>
    %cst_9 = arith.constant dense<0x7F800000> : vector<16xf32>
    %31 = vector.multi_reduction <minimumf>, %30, %cst_9 [0] : vector<8x16xf32> to vector<16xf32>
    %32 = vector.shape_cast %31 : vector<16xf32> to vector<1x16xf32>
    %33 = vector.broadcast %32 : vector<1x16xf32> to vector<8x16xf32>
    %34 = arith.cmpf ole, %30, %33 : vector<8x16xf32>
    %c1073741824_i32 = arith.constant 1073741824 : i32
    %35 = vector.broadcast %c1073741824_i32 : i32 to vector<8x16xi32>
    %36 = arith.select %34, %10, %35 : vector<8x16xi1>, vector<8x16xi32>
    %cst_10 = arith.constant dense<2147483647> : vector<16xi32>
    %37 = vector.multi_reduction <minsi>, %36, %cst_10 [0] : vector<8x16xi32> to vector<16xi32>
    %38 = vector.shape_cast %37 : vector<16xi32> to vector<1x16xi32>
    %39 = arith.cmpf olt, %32, %2 : vector<1x16xf32>
    %40 = arith.cmpf olt, %32, %4 : vector<1x16xf32>
    %41 = arith.cmpf olt, %32, %6 : vector<1x16xf32>
    %42 = arith.select %39, %32, %2 : vector<1x16xi1>, vector<1x16xf32>
    %43 = arith.select %39, %38, %3 : vector<1x16xi1>, vector<1x16xi32>
    %44 = arith.select %40, %32, %4 : vector<1x16xi1>, vector<1x16xf32>
    %45 = arith.select %39, %2, %44 : vector<1x16xi1>, vector<1x16xf32>
    %46 = arith.select %40, %38, %5 : vector<1x16xi1>, vector<1x16xi32>
    %47 = arith.select %39, %3, %46 : vector<1x16xi1>, vector<1x16xi32>
    %48 = arith.select %41, %32, %6 : vector<1x16xi1>, vector<1x16xf32>
    %49 = arith.select %40, %4, %48 : vector<1x16xi1>, vector<1x16xf32>
    %50 = arith.select %41, %38, %7 : vector<1x16xi1>, vector<1x16xi32>
    %51 = arith.select %40, %5, %50 : vector<1x16xi1>, vector<1x16xi32>
    %52 = vector.broadcast %38 : vector<1x16xi32> to vector<8x16xi32>
    %53 = arith.cmpi eq, %10, %52 : vector<8x16xi32>
    %cst_11 = arith.constant 1.000000e+30 : f32
    %54 = vector.broadcast %cst_11 : f32 to vector<8x16xf32>
    %55 = arith.select %53, %54, %30 : vector<8x16xi1>, vector<8x16xf32>
    %cst_12 = arith.constant dense<0x7F800000> : vector<16xf32>
    %56 = vector.multi_reduction <minimumf>, %55, %cst_12 [0] : vector<8x16xf32> to vector<16xf32>
    %57 = vector.shape_cast %56 : vector<16xf32> to vector<1x16xf32>
    %58 = vector.broadcast %57 : vector<1x16xf32> to vector<8x16xf32>
    %59 = arith.cmpf ole, %55, %58 : vector<8x16xf32>
    %c1073741824_i32_13 = arith.constant 1073741824 : i32
    %60 = vector.broadcast %c1073741824_i32_13 : i32 to vector<8x16xi32>
    %61 = arith.select %59, %10, %60 : vector<8x16xi1>, vector<8x16xi32>
    %cst_14 = arith.constant dense<2147483647> : vector<16xi32>
    %62 = vector.multi_reduction <minsi>, %61, %cst_14 [0] : vector<8x16xi32> to vector<16xi32>
    %63 = vector.shape_cast %62 : vector<16xi32> to vector<1x16xi32>
    %64 = arith.cmpf olt, %57, %42 : vector<1x16xf32>
    %65 = arith.cmpf olt, %57, %45 : vector<1x16xf32>
    %66 = arith.cmpf olt, %57, %49 : vector<1x16xf32>
    %67 = arith.select %64, %57, %42 : vector<1x16xi1>, vector<1x16xf32>
    %68 = arith.select %64, %63, %43 : vector<1x16xi1>, vector<1x16xi32>
    %69 = arith.select %65, %57, %45 : vector<1x16xi1>, vector<1x16xf32>
    %70 = arith.select %64, %42, %69 : vector<1x16xi1>, vector<1x16xf32>
    %71 = arith.select %65, %63, %47 : vector<1x16xi1>, vector<1x16xi32>
    %72 = arith.select %64, %43, %71 : vector<1x16xi1>, vector<1x16xi32>
    %73 = arith.select %66, %57, %49 : vector<1x16xi1>, vector<1x16xf32>
    %74 = arith.select %65, %45, %73 : vector<1x16xi1>, vector<1x16xf32>
    %75 = arith.select %66, %63, %51 : vector<1x16xi1>, vector<1x16xi32>
    %76 = arith.select %65, %47, %75 : vector<1x16xi1>, vector<1x16xi32>
    %77 = vector.broadcast %63 : vector<1x16xi32> to vector<8x16xi32>
    %78 = arith.cmpi eq, %10, %77 : vector<8x16xi32>
    %cst_15 = arith.constant 1.000000e+30 : f32
    %79 = vector.broadcast %cst_15 : f32 to vector<8x16xf32>
    %80 = arith.select %78, %79, %55 : vector<8x16xi1>, vector<8x16xf32>
    %cst_16 = arith.constant dense<0x7F800000> : vector<16xf32>
    %81 = vector.multi_reduction <minimumf>, %80, %cst_16 [0] : vector<8x16xf32> to vector<16xf32>
    %82 = vector.shape_cast %81 : vector<16xf32> to vector<1x16xf32>
    %83 = vector.broadcast %82 : vector<1x16xf32> to vector<8x16xf32>
    %84 = arith.cmpf ole, %80, %83 : vector<8x16xf32>
    %c1073741824_i32_17 = arith.constant 1073741824 : i32
    %85 = vector.broadcast %c1073741824_i32_17 : i32 to vector<8x16xi32>
    %86 = arith.select %84, %10, %85 : vector<8x16xi1>, vector<8x16xi32>
    %cst_18 = arith.constant dense<2147483647> : vector<16xi32>
    %87 = vector.multi_reduction <minsi>, %86, %cst_18 [0] : vector<8x16xi32> to vector<16xi32>
    %88 = vector.shape_cast %87 : vector<16xi32> to vector<1x16xi32>
    %89 = arith.cmpf olt, %82, %67 : vector<1x16xf32>
    %90 = arith.cmpf olt, %82, %70 : vector<1x16xf32>
    %91 = arith.cmpf olt, %82, %74 : vector<1x16xf32>
    %92 = arith.select %89, %82, %67 : vector<1x16xi1>, vector<1x16xf32>
    %93 = arith.select %89, %88, %68 : vector<1x16xi1>, vector<1x16xi32>
    %94 = arith.select %90, %82, %70 : vector<1x16xi1>, vector<1x16xf32>
    %95 = arith.select %89, %67, %94 : vector<1x16xi1>, vector<1x16xf32>
    %96 = arith.select %90, %88, %72 : vector<1x16xi1>, vector<1x16xi32>
    %97 = arith.select %89, %68, %96 : vector<1x16xi1>, vector<1x16xi32>
    %98 = arith.select %91, %82, %74 : vector<1x16xi1>, vector<1x16xf32>
    %99 = arith.select %90, %70, %98 : vector<1x16xi1>, vector<1x16xf32>
    %100 = arith.select %91, %88, %76 : vector<1x16xi1>, vector<1x16xi32>
    %101 = arith.select %90, %72, %100 : vector<1x16xi1>, vector<1x16xi32>
    %cst_19 = arith.constant 9.99999993E-9 : f32
    %102 = vector.broadcast %cst_19 : f32 to vector<1x16xf32>
    %103 = arith.addf %92, %102 : vector<1x16xf32>
    %104 = tpu.reciprocal %103 {approx = true} : vector<1x16xf32> -> vector<1x16xf32>
    %cst_20 = arith.constant 9.99999993E-9 : f32
    %105 = vector.broadcast %cst_20 : f32 to vector<1x16xf32>
    %106 = arith.addf %95, %105 : vector<1x16xf32>
    %107 = tpu.reciprocal %106 {approx = true} : vector<1x16xf32> -> vector<1x16xf32>
    %cst_21 = arith.constant 9.99999993E-9 : f32
    %108 = vector.broadcast %cst_21 : f32 to vector<1x16xf32>
    %109 = arith.addf %99, %108 : vector<1x16xf32>
    %110 = tpu.reciprocal %109 {approx = true} : vector<1x16xf32> -> vector<1x16xf32>
    %111 = arith.addf %104, %107 : vector<1x16xf32>
    %112 = arith.addf %111, %110 : vector<1x16xf32>
    %113 = tpu.reciprocal %112 {approx = true} : vector<1x16xf32> -> vector<1x16xf32>
    %114 = arith.mulf %104, %113 : vector<1x16xf32>
    %115 = arith.mulf %107, %113 : vector<1x16xf32>
    %116 = arith.mulf %110, %113 : vector<1x16xf32>
    %117 = tpu.iota {dimensions = array<i32: 0>} : vector<8x16xi32>
    %118 = vector.broadcast %93 : vector<1x16xi32> to vector<8x16xi32>
    %119 = arith.cmpi eq, %117, %118 : vector<8x16xi32>
    %cst_22 = arith.constant 0.000000e+00 : f32
    %120 = vector.shape_cast %114 : vector<1x16xf32> to vector<1x16xf32>
    %121 = vector.broadcast %120 : vector<1x16xf32> to vector<8x16xf32>
    %122 = vector.broadcast %cst_22 : f32 to vector<8x16xf32>
    %123 = arith.select %119, %121, %122 : vector<8x16xi1>, vector<8x16xf32>
    %124 = vector.broadcast %97 : vector<1x16xi32> to vector<8x16xi32>
    %125 = arith.cmpi eq, %117, %124 : vector<8x16xi32>
    %cst_23 = arith.constant 0.000000e+00 : f32
    %126 = vector.shape_cast %115 : vector<1x16xf32> to vector<1x16xf32>
    %127 = vector.broadcast %126 : vector<1x16xf32> to vector<8x16xf32>
    %128 = vector.broadcast %cst_23 : f32 to vector<8x16xf32>
    %129 = arith.select %125, %127, %128 : vector<8x16xi1>, vector<8x16xf32>
    %130 = arith.addf %123, %129 : vector<8x16xf32>
    %131 = vector.broadcast %101 : vector<1x16xi32> to vector<8x16xi32>
    %132 = arith.cmpi eq, %117, %131 : vector<8x16xi32>
    %cst_24 = arith.constant 0.000000e+00 : f32
    %133 = vector.shape_cast %116 : vector<1x16xf32> to vector<1x16xf32>
    %134 = vector.broadcast %133 : vector<1x16xf32> to vector<8x16xf32>
    %135 = vector.broadcast %cst_24 : f32 to vector<8x16xf32>
    %136 = arith.select %132, %134, %135 : vector<8x16xi1>, vector<8x16xf32>
    %137 = arith.addf %130, %136 : vector<8x16xf32>
    %c0_25 = arith.constant 0 : index
    %c0_26 = arith.constant 0 : index
    %c0_27 = arith.constant 0 : index
    %138 = vector.load %arg4[%c0_25, %c0_26, %c0_27] : memref<1x6x8xf32, #tpu.memory_space<vmem>>, vector<1x6x8xf32>
    %139 = vector.shape_cast %138 : vector<1x6x8xf32> to vector<6x8xf32>
    %140 = arith.truncf %139 : vector<6x8xf32> to vector<6x8xbf16>
    %141 = arith.truncf %137 : vector<8x16xf32> to vector<8x16xbf16>
    %cst_28 = arith.constant dense<0.000000e+00> : vector<6x16xf32>
    %142 = tpu.matmul %140, %141, %cst_28 {dimension_numbers = #tpu.dot_dimension_numbers<[1], [0], [0], [1], [0, 0, 1, 1], [], []>} : vector<6x8xbf16>, vector<8x16xbf16>, vector<6x16xf32> -> vector<6x16xf32>
    %c0_29 = arith.constant 0 : index
    %c0_30 = arith.constant 0 : index
    %143 = vector.load %arg6[%c0_29, %c0_30] : memref<32x6xbf16, #tpu.memory_space<vmem>>, vector<32x6xbf16>
    %144 = arith.truncf %142 : vector<6x16xf32> to vector<6x16xbf16>
    %cst_31 = arith.constant dense<0.000000e+00> : vector<32x16xf32>
    %145 = tpu.matmul %143, %144, %cst_31 {dimension_numbers = #tpu.dot_dimension_numbers<[1], [0], [0], [1], [0, 0, 1, 1], [], []>} : vector<32x6xbf16>, vector<6x16xbf16>, vector<32x16xf32> -> vector<32x16xf32>
    %c0_32 = arith.constant 0 : index
    %c0_33 = arith.constant 0 : index
    %146 = vector.load %arg7[%c0_32, %c0_33] : memref<32x4xbf16, #tpu.memory_space<vmem>>, vector<32x4xbf16>
    %c0_34 = arith.constant 0 : index
    %c0_35 = arith.constant 0 : index
    %c0_36 = arith.constant 0 : index
    %147 = vector.load %arg5[%c0_34, %c0_35, %c0_36] : memref<1x4x16xf32, #tpu.memory_space<vmem>>, vector<1x4x16xf32>
    %148 = vector.shape_cast %147 : vector<1x4x16xf32> to vector<4x16xf32>
    %149 = arith.truncf %148 : vector<4x16xf32> to vector<4x16xbf16>
    %cst_37 = arith.constant dense<0.000000e+00> : vector<32x16xf32>
    %150 = tpu.matmul %146, %149, %cst_37 {dimension_numbers = #tpu.dot_dimension_numbers<[1], [0], [0], [1], [0, 0, 1, 1], [], []>} : vector<32x4xbf16>, vector<4x16xbf16>, vector<32x16xf32> -> vector<32x16xf32>
    %151 = arith.addf %145, %150 : vector<32x16xf32>
    %c0_38 = arith.constant 0 : index
    %c0_39 = arith.constant 0 : index
    %152 = vector.load %arg8[%c0_38, %c0_39] : memref<32x1xf32, #tpu.memory_space<vmem>>, vector<32x1xf32>
    %153 = vector.broadcast %152 : vector<32x1xf32> to vector<32x16xf32>
    %154 = arith.addf %151, %153 : vector<32x16xf32>
    %cst_40 = arith.constant 0.000000e+00 : f32
    %155 = vector.broadcast %cst_40 : f32 to vector<32x16xf32>
    %156 = arith.maximumf %154, %155 : vector<32x16xf32>
    %c0_41 = arith.constant 0 : index
    %c0_42 = arith.constant 0 : index
    %157 = vector.load %arg9[%c0_41, %c0_42] : memref<16x32xbf16, #tpu.memory_space<vmem>>, vector<16x32xbf16>
    %158 = arith.truncf %156 : vector<32x16xf32> to vector<32x16xbf16>
    %cst_43 = arith.constant dense<0.000000e+00> : vector<16x16xf32>
    %159 = tpu.matmul %157, %158, %cst_43 {dimension_numbers = #tpu.dot_dimension_numbers<[1], [0], [0], [1], [0, 0, 1, 1], [], []>} : vector<16x32xbf16>, vector<32x16xbf16>, vector<16x16xf32> -> vector<16x16xf32>
    %c0_44 = arith.constant 0 : index
    %c0_45 = arith.constant 0 : index
    %160 = vector.load %arg10[%c0_44, %c0_45] : memref<16x1xf32, #tpu.memory_space<vmem>>, vector<16x1xf32>
    %161 = vector.broadcast %160 : vector<16x1xf32> to vector<16x16xf32>
    %162 = arith.addf %159, %161 : vector<16x16xf32>
    %cst_46 = arith.constant 0.000000e+00 : f32
    %163 = vector.broadcast %cst_46 : f32 to vector<16x16xf32>
    %164 = arith.maximumf %162, %163 : vector<16x16xf32>
    %c0_47 = arith.constant 0 : index
    %c0_48 = arith.constant 0 : index
    %c0_49 = arith.constant 0 : index
    %165 = vector.load %arg11[%c0_47, %c0_48, %c0_49] : memref<1x16x16xf32, #tpu.memory_space<vmem>>, vector<1x16x16xf32>
    %166 = vector.shape_cast %165 : vector<1x16x16xf32> to vector<16x16xf32>
    %167 = vector.shape_cast %164 : vector<16x16xf32> to vector<1x16x16xf32>
    tpu.vector_store %arg11[%c0_47, %c0_48, %c0_49], %167 {strides = array<i32>} : memref<1x16x16xf32, #tpu.memory_space<vmem>>, vector<1x16x16xf32>,
    return
  }
  func.func @transform_0(%arg0: i32, %arg1: i32) -> (i32, i32, i32) {
    %c0_i32 = arith.constant 0 : i32
    %c0_i32_0 = arith.constant 0 : i32
    return %arg0, %c0_i32, %arg1 : i32, i32, i32
  }
  func.func @transform_1(%arg0: i32, %arg1: i32) -> (i32, i32, i32) {
    %c0_i32 = arith.constant 0 : i32
    %c0_i32_0 = arith.constant 0 : i32
    %c0_i32_1 = arith.constant 0 : i32
    return %arg0, %c0_i32, %c0_i32_0 : i32, i32, i32
  }
  func.func @transform_2(%arg0: i32, %arg1: i32) -> (i32, i32, i32) {
    %c0_i32 = arith.constant 0 : i32
    %c0_i32_0 = arith.constant 0 : i32
    %c0_i32_1 = arith.constant 0 : i32
    return %arg0, %c0_i32, %c0_i32_0 : i32, i32, i32
  }
  func.func @transform_3(%arg0: i32, %arg1: i32) -> (i32, i32, i32) {
    %c0_i32 = arith.constant 0 : i32
    %c0_i32_0 = arith.constant 0 : i32
    return %arg0, %c0_i32, %arg1 : i32, i32, i32
  }
  func.func @transform_4(%arg0: i32, %arg1: i32) -> (i32, i32) {
    %c0_i32 = arith.constant 0 : i32
    %c0_i32_0 = arith.constant 0 : i32
    %c0_i32_1 = arith.constant 0 : i32
    return %c0_i32, %c0_i32_0 : i32, i32
  }
  func.func @transform_5(%arg0: i32, %arg1: i32) -> (i32, i32) {
    %c0_i32 = arith.constant 0 : i32
    %c0_i32_0 = arith.constant 0 : i32
    %c0_i32_1 = arith.constant 0 : i32
    return %c0_i32, %c0_i32_0 : i32, i32
  }
  func.func @transform_6(%arg0: i32, %arg1: i32) -> (i32, i32) {
    %c0_i32 = arith.constant 0 : i32
    %c0_i32_0 = arith.constant 0 : i32
    %c0_i32_1 = arith.constant 0 : i32
    return %c0_i32, %c0_i32_0 : i32, i32
  }
  func.func @transform_7(%arg0: i32, %arg1: i32) -> (i32, i32) {
    %c0_i32 = arith.constant 0 : i32
    %c0_i32_0 = arith.constant 0 : i32
    %c0_i32_1 = arith.constant 0 : i32
    return %c0_i32, %c0_i32_0 : i32, i32
  }
  func.func @transform_8(%arg0: i32, %arg1: i32) -> (i32, i32) {
    %c0_i32 = arith.constant 0 : i32
    %c0_i32_0 = arith.constant 0 : i32
    %c0_i32_1 = arith.constant 0 : i32
    return %c0_i32, %c0_i32_0 : i32, i32
  }
  func.func @transform_9(%arg0: i32, %arg1: i32) -> (i32, i32, i32) {
    %c0_i32 = arith.constant 0 : i32
    %c0_i32_0 = arith.constant 0 : i32
    return %arg0, %c0_i32, %arg1 : i32, i32, i32
  }
}

</mosaic_0001>

<bundles_post_ra>
// kernel: tpu_custom_call.1
= control target key start
LH: loop header
LB: loop body
LE: loop exit
PB: predicated region body
PF: predicated region fallthrough
CT: control target
= control target key end

     0   :  { %14 = vsyncpa [#allocation3], 0  ;;  %s1493_s0 = inlined_call_operand.vmem [shape: f32[2,3,16], index: 0, kind: input, shape index: {}]   ;;  %s1494_s1 = inlined_call_operand.vmem [shape: f32[2,8,3], index: 1, kind: input, shape index: {}]   ;;  %s1495_s2 = inlined_call_operand.vmem [shape: f32[2,6,8], index: 2, kind: input, shape index: {}]   ;;  %s1496_s3 = inlined_call_operand.vmem [shape: f32[2,4,16], index: 3, kind: input, shape index: {}]   ;;  %s1497_s4 = inlined_call_operand.vmem [shape: bf16[32,6], index: 4, kind: input, shape index: {}]   ;;  %s1498_s5 = inlined_call_operand.vmem [shape: bf16[32,4], index: 5, kind: input, shape index: {}]   ;;  %s1499_s6 = inlined_call_operand.vmem [shape: f32[32,1], index: 6, kind: input, shape index: {}]   ;;  %s1500_s7 = inlined_call_operand.vmem [shape: bf16[16,32], index: 7, kind: input, shape index: {}]   ;;  %s1501_s8 = inlined_call_operand.vmem [shape: f32[16,1], index: 8, kind: input, shape index: {}]   ;;  %s1502_s9 = inlined_call_operand.hbm [shape: f32[2,16,16], index: 9, kind: output, shape index: {}]  }
   0x1   :  { %16 = vsyncpa [#allocation3 + $0x1], 0  ;;  %s1280_s30 = smov 0   ;;  %s1282_s10 = smov 0  }
   0x2   :  { %s1284_s11 = smov 0   ;;  %s1286_s12 = smov 0  }
   0x3   :  { %s1288_s13 = smov 0   ;;  %s1290_s14 = smov 0  }
   0x4 LB: > { %s992_s15 = sadd.s32 4294967295, %s1220_s14   ;;  %s993_s16 = sadd.s32 4294967294, %s1220_s14   ;;  %s1220_s14 = sphi %s1290_s14, %s22_s14   ;;  %s1216_s13 = sphi %s1288_s13, %s1509_s13   ;;  %s1212_s12 = sphi %s1286_s12, %s1508_s12   ;;  %s1208_s11 = sphi %s1284_s11, %s1507_s11   ;;  %s1204_s10 = sphi %s1282_s10, %s1506_s10   ;;  %s1200_s30 = sphi %s1280_s30, %s1505_s30  }
   0x5   : > { %s34_s17 = sadd.s32 1, %s1216_s13  ;;  %s256_s18 = sadd.s32 1, %s1208_s11 }
   0x6   : > { %p36_p0 = scmp.ge.s32.totalorder %s34_s17, 2  ;;  %p266_p1 = scmp.ne.s32.totalorder %s1208_s11, %s1204_s10 }
   0x7   : > { %p267_p2 = scmp.eq.s32.totalorder %s992_s15, 1  ;;  %p272_p3 = scmp.ne.s32.totalorder %s1204_s10, %s1200_s30 }
   0x8   : > { %s1511_s17 = smov (%p36_p0, %s34_s17), 0  ;;  %p273_p5 = scmp.eq.s32.totalorder %s993_s16, 1 }
   0x9   : > { %p1320_p4 = por %p267_p2, %p266_p1  ;;  %s251_s20 = ssub.s32 %s1216_s13, %s1511_s17 }
   0xa   : > { %p996_p6 = scmp.ge.s32.totalorder %s1220_s14, 1  ;;  %p254_p7 = scmp.eq.s32.totalorder %s251_s20, 0 }
   0xb   : > { %p1327_p8 = por %p273_p5, %p272_p3  ;;  %p340_p9 = scmp.lt.s32.totalorder %s1220_s14, 3 }
   0xc   : > { %s1333_s22 = scalar_select %p254_p7, %s1208_s11, %s256_s18  }
   0xd   : > { %p341_p10 = pnand %p996_p6, %p340_p9 }
   0xe   : > { %p393_p11 = scmp.lt.s32.totalorder (!%p341_p10), %s1212_s12, 1  ;;  %v1222_v0 = vmov (!%p341_p10), 0   ;;  %v1223_v1 = vmov (!%p341_p10), 2   ;;  %v1224_v3 = vmov (!%p341_p10), 1   ;;  %v1225_v4 = vmov (!%p341_p10), 0.0   ;;  %v1129_v16 = vld [vmem:[%s1498_s5] sm:$0xff] (!%p341_p10)  }
   0xf   : > { %344 = sbr.rel (%p341_p10) target bundleno = 964 (0x3c4), region = 56  ;;  %1124 = vset.pattern.permute.xlu0 (!%p341_p10), %v1222_v0  ;;  %1126 = vset.pattern.permute.xlu1 (!%p341_p10), %v1223_v1  ;;  %v418_v5 = vlaneseq (!%p341_p10)  ;;  %vm1226_vm0 = vmmov (!%p341_p10), 0   ;;  %vm631_vm1 = vcmask (!%p341_p10), 31744   ;;  %vm638_vm2 = vcmask (!%p341_p10), 1041408   ;;  %v1130_v24 = vld [vmem:[%s1498_s5 + $0x8] sm:$0xff] (!%p341_p10)   ;;  %s390_s15 = sand.u32 (!%p341_p10), 1, %s1204_s10  }
  0x10   : > { %1030 = vmatprep.subr.bf16.mxu0 (!%p341_p10), %v1225_v4  ;;  %1032 = vmatprep.mubr.msk.bf16.mxu0 (!%p341_p10), %vm1226_vm0, %v1225_v4  ;;  %vm453_vm3 = vcmask (!%p341_p10), 130048   ;;  %s1447_s26 = scalar_lea.sflag (!%p341_p10), [#allocation3], %s390_s15 }
  0x11   : > { %v1347_v6 = vshrl.u32 (!%p341_p10), %v418_v5, 7  ;;  %1038 = vmatprep.mubr.msk.bf16.mxu1 (!%p341_p10), %vm631_vm1, %v1129_v16 }
  0x13   : > { %v427_v7 = vsub.s32 (!%p341_p10), 0, %v1347_v6  ;;  %v448_v8 = vsub.s32 (!%p341_p10), 2, %v1347_v6  ;;  %v437_v10 = vsub.s32 (!%p341_p10), 1, %v1347_v6 }
  0x16   : > { %s1337_s23 = scalar_select %p393_p11, %s1212_s12, 1 }
  0x18   : > { %s999_s24 = sshll.u32 %s1337_s23, 3  ;;  %s998_s28 = sshll.u32 %s1337_s23, 2 }
  0x19   : > { %s403_s27 = scalar_lea.vmem %s1494_s1, %s999_s24  ;;  %s399_s16 = scalar_lea.vmem %s1493_s0, %s998_s28 }
  0x1a   : > { %v417_v2 = vld [vmem:[%s403_s27] sm:$0xff]  ;;  %s414_s25 = scalar_lea.vmem %s1496_s3, %s998_s28  ;;  %s407_s18 = scalar_lea.vmem %s1495_s2, %s999_s24 }
  0x1b   : > { %422 = vperm.xlu0 %1124, %v417_v2   ;;  %443 = vperm.xlu1 %1126, %v417_v2   ;;  %v416_v9 = vld [vmem:[%s399_s16] sm:$0x7]  ;;  %s997_s28 = sshll.u32 %s390_s15, 4  ;;  %s1018_s23 = sshll.u32 %s1212_s12, 8 }
  0x1c   : > { %v428_v12 = vrot.slane %v416_v9, %v427_v7  ;;  %v449_v13 = vrot.slane %v416_v9, %v448_v8  ;;  %v438_v15 = vrot.slane %v416_v9, %v437_v10  ;;  %v619_v19 = vld [vmem:[%s414_s25] sm:$0xf]  ;;  %s392_s16 = scalar_lea.vmem [#allocation2], %s997_s28  ;;  %s1444_s25 = scalar_lea.hbm %s1502_s9, %s1018_s23 }
  0x1d   : > { %v620_v21 = vpack.c.bf16 %v619_v19, %v619_v19  ;;  %s1227_s27 = smov [#allocation2]  }
  0x1e   : > { %s1146_s29 = sshll.u32 %s1227_s27, 4  ;;  %s1147_s29 = int_to_ptr.vmem [resolvable:$false] %s1146_s29 }
  0x1f   : > { %1125 = vset.pattern.permute.xlu0 %v1224_v3  ;;  %1127 = vset.pattern.permute.xlu1 %v1222_v0  ;;  %v640_v23 = vsel %vm638_vm2, %v620_v21, 0  ;;  %s1148_s28 = scalar_lea.vmem %s1147_s29, 512 }
  0x20   : > { %432 = vperm.xlu0 %1125, %v417_v2   ;;  %1060 = vmatprep.subr.msk.bf16.mxu1 %vm638_vm2, %v620_v21 }
  0x21   : > { %1037 = vmatpush3.bf16.msra.mxu1 %v640_v23 }
  0x24   : > { %1128 = vset.pattern.permute.xlu0 %v1222_v0  ;;  %1039 = vmatmul.mubr.msk.bf16.vlgmr.msra.gmra.mrb[0].mxu1 %vm631_vm1, %v1130_v24 }
  0x9a   : > { %v423_v11 = vpop.permute.xlu0 %422  ;;  %v444_v14 = vpop.permute.xlu1 %443 }
  0x9b   : > { %v429_v17 = vsub.f32 %v423_v11, %v428_v12  ;;  %v450_v18 = vsub.f32 %v444_v14, %v449_v13 }
  0x9d   : > { %v430_v25 = vmul.f32 %v429_v17, %v429_v17  ;;  %v451_v27 = vmul.f32 %v450_v18, %v450_v18 }
  0x9f   : > { %v433_v20 = vpop.permute.xlu0 %432 }
  0xa0   : > { %v439_v22 = vsub.f32 %v433_v20, %v438_v15 }
  0xa2   : > { %v440_v26 = vmul.f32 %v439_v22, %v439_v22 }
  0xa4   : > { %v441_v28 = vadd.f32 %v440_v26, %v430_v25 }
  0xa6   : > { %v452_v29 = vadd.f32 %v451_v27, %v441_v28 }
  0xa8   : > { %v454_v30 = vsel %vm453_vm3, %v452_v29, inf }
  0xa9   : > { %v455_v31 = vrot.slane %v454_v30, 4 }
  0xab   : > { %v456_v32 = vmin.f32 %v454_v30, %v455_v31 }
  0xad   : > { %v457_v33 = vrot.slane %v456_v32, 2 }
  0xaf   : > { %v458_v34 = vmin.f32 %v456_v32, %v457_v33 }
  0xb1   : > { %v459_v35 = vrot.slane %v458_v34, 1 }
  0xb3   : > { %v460_v36 = vmin.f32 %v458_v34, %v459_v35 }
  0xb5   : > { %vm461_vm4 = vcmp.le.f32.partialorder %v452_v29, %v460_v36  ;;  %vm473_vm8 = vcmp.lt.f32.partialorder %v460_v36, 1e+30 }
  0xb6   : > { %v462_v37 = vsel %vm461_vm4, %v1347_v6, 1073741824  ;;  %v474_v61 = vsel %vm473_vm8, %v460_v36, 1e+30 }
  0xb7   : > { %v463_v38 = vsel %vm453_vm3, %v462_v37, 2147483647 }
  0xb8   : > { %v464_v39 = vrot.slane %v463_v38, 4 }
  0xba   : > { %vm465_vm5 = vcmp.lt.s32.totalorder %v463_v38, %v464_v39 }
  0xbb   : > { %v466_v40 = vsel %vm465_vm5, %v463_v38, %v464_v39 }
  0xbc   : > { %v467_v41 = vrot.slane %v466_v40, 2 }
  0xbe   : > { %vm468_vm6 = vcmp.lt.s32.totalorder %v466_v40, %v467_v41 }
  0xbf   : > { %v469_v42 = vsel %vm468_vm6, %v466_v40, %v467_v41 }
  0xc0   : > { %v470_v43 = vrot.slane %v469_v42, 1 }
  0xc2   : > { %vm471_vm7 = vcmp.lt.s32.totalorder %v469_v42, %v470_v43 }
  0xc3   : > { %v472_v44 = vsel %vm471_vm7, %v469_v42, %v470_v43 }
  0xc4   : > { %vm476_vm9 = vcmp.eq.s32.totalorder %v1347_v6, %v472_v44  ;;  %v475_v45 = vsel %vm473_vm8, %v472_v44, 4294967295 }
  0xc5   : > { %v477_v46 = vsel %vm476_vm9, 1e+30, %v452_v29 }
  0xc6   : > { %v478_v47 = vsel %vm453_vm3, %v477_v46, inf }
  0xc7   : > { %v479_v48 = vrot.slane %v478_v47, 4 }
  0xc9   : > { %v480_v49 = vmin.f32 %v478_v47, %v479_v48 }
  0xcb   : > { %v481_v50 = vrot.slane %v480_v49, 2 }
  0xcd   : > { %v482_v51 = vmin.f32 %v480_v49, %v481_v50  ;;  %v559_v50 = vld [vmem:[%s407_s18] sm:$0x3f]  ;;  %s878_s18 = sshll.u32 %s392_s16, 4  ;;  %s1438_s18 = int_to_ptr.vmem [resolvable:$true] %s878_s18 }
  0xce   : > { %s1142_s12 = scalar_lea.vmem %s1438_s18, 256  ;;  %p1149_p1 = scmp.lt.s32.totalorder %s1438_s18, %s1147_s29 }
  0xcf   : > { %v483_v52 = vrot.slane %v482_v51, 1  ;;  %p1143_p12 = scmp.ne.s32.totalorder %s1438_s18, %s1142_s12  ;;  %p1150_p2 = scmp.lt.s32.totalorder %s1148_s28, %s1142_s12 }
  0xd1   : > { %v484_v53 = vmin.f32 %v482_v51, %v483_v52  ;;  %v560_v52 = vpack.c.bf16 %v559_v50, %v559_v50  ;;  %p1144_p13 = pnand %p1143_p12, %p1320_p4  ;;  %p1151_p3 = por %p1150_p2, %p1149_p1 }
  0xd3   : > { %vm485_vm10 = vcmp.le.f32.partialorder %v477_v46, %v484_v53  ;;  %vm497_vm14 = vcmp.lt.f32.partialorder %v484_v53, %v474_v61  ;;  %vm498_vm15 = vcmp.lt.f32.partialorder %v484_v53, 1e+30  ;;  %p1145_p0 = pneg %p1144_p13 }
  0xd4   : > { %v486_v54 = vsel %vm485_vm10, %v1347_v6, 1073741824  ;;  %v501_v11 = vsel %vm498_vm15, %v484_v53, 1e+30  ;;  %v499_v13 = vsel %vm497_vm14, %v484_v53, %v474_v61 }
  0xd5   : > { %v487_v55 = vsel %vm453_vm3, %v486_v54, 2147483647  ;;  %v502_v14 = vsel %vm497_vm14, %v474_v61, %v501_v11  ;;  %v761_v54 = vld [vmem:[%s1499_s6] sm:$0xff]  ;;  %p1152_p5 = pnand %p1151_p3, %p1145_p0 }
  0xd6   : > { %v488_v56 = vrot.slane %v487_v55, 4  ;;  %767 = vperm.xlu1 %1127, %v761_v54  }
  0xd8   : > { %vm489_vm11 = vcmp.lt.s32.totalorder %v487_v55, %v488_v56 }
  0xd9   : > { %v490_v57 = vsel %vm489_vm11, %v487_v55, %v488_v56  ;;  %v763_v55 = vld [vmem:[%s1499_s6 + $0x10] sm:$0xff]  ;;  %v762_v56 = vld [vmem:[%s1499_s6 + $0x8] sm:$0xff] }
  0xda   : > { %v491_v58 = vrot.slane %v490_v57, 2  ;;  %777 = vperm.xlu0 %1128, %v763_v55   ;;  %772 = vperm.xlu1 %1127, %v762_v56  }
  0xdc   : > { %vm492_vm12 = vcmp.lt.s32.totalorder %v490_v57, %v491_v58 }
  0xdd   : > { %v493_v59 = vsel %vm492_vm12, %v490_v57, %v491_v58  ;;  %v798_v57 = vld [vmem:[%s1501_s8 + $0x8] sm:$0xff]  ;;  %v764_v58 = vld [vmem:[%s1499_s6 + $0x18] sm:$0xff] }
  0xde   : > { %v494_v60 = vrot.slane %v493_v59, 1  ;;  %806 = vperm.xlu0 %1128, %v798_v57   ;;  %782 = vperm.xlu1 %1127, %v764_v58  }
  0xe0   : > { %vm495_vm13 = vcmp.lt.s32.totalorder %v493_v59, %v494_v60 }
  0xe1   : > { %v496_v62 = vsel %vm495_vm13, %v493_v59, %v494_v60  ;;  %vm566_vm13 = vcmask 1043456   ;;  %v797_v59 = vld [vmem:[%s1501_s8] sm:$0xff] }
  0xe2   : > { %vm505_vm1 = vcmp.eq.s32.totalorder %v1347_v6, %v496_v62  ;;  %v500_v63 = vsel %vm497_vm14, %v496_v62, %v475_v45  ;;  %v503_v0 = vsel %vm498_vm15, %v496_v62, 4294967295  ;;  %vm701_vm15 = vcmask 48128   ;;  %801 = vperm.xlu1 %1127, %v797_v59  }
  0xe3   : > { %v506_v1 = vsel %vm505_vm1, 1e+30, %v477_v46  ;;  %v504_v2 = vsel %vm497_vm14, %v475_v45, %v503_v0  ;;  %vm562_vm14 = vcmask 64512   ;;  %vm814_vm1 = vcmask 261120  }
  0xe4   : > { %v507_v3 = vsel %vm453_vm3, %v506_v1, inf }
  0xe5   : > { %v508_v5 = vrot.slane %v507_v3, 4 }
  0xe7   : > { %v509_v7 = vmin.f32 %v507_v3, %v508_v5 }
  0xe9   : > { %v510_v8 = vrot.slane %v509_v7, 2 }
  0xeb   : > { %v511_v9 = vmin.f32 %v509_v7, %v510_v8 }
  0xed   : > { %v512_v10 = vrot.slane %v511_v9, 1 }
  0xef   : > { %v513_v12 = vmin.f32 %v511_v9, %v512_v10 }
  0xf1   : > { %vm514_vm2 = vcmp.le.f32.partialorder %v506_v1, %v513_v12  ;;  %vm526_vm4 = vcmp.lt.f32.partialorder %v513_v12, %v499_v13  ;;  %vm527_vm5 = vcmp.lt.f32.partialorder %v513_v12, %v502_v14  ;;  %vm528_vm6 = vcmp.lt.f32.partialorder %v513_v12, 1e+30 }
  0xf2   : > { %v515_v15 = vsel %vm514_vm2, %v1347_v6, 1073741824  ;;  %v529_v16 = vsel %vm526_vm4, %v513_v12, %v499_v13  ;;  %v531_v17 = vsel %vm527_vm5, %v513_v12, %v502_v14  ;;  %v535_v18 = vsel %vm528_vm6, %v513_v12, 1e+30 }
  0xf3   : > { %v516_v19 = vsel %vm453_vm3, %v515_v15, 2147483647  ;;  %v532_v20 = vsel %vm526_vm4, %v499_v13, %v531_v17  ;;  %v536_v21 = vsel %vm527_vm5, %v502_v14, %v535_v18  ;;  %v539_v22 = vadd.f32 1e-08, %v529_v16 }
  0xf4   : > { %v517_v23 = vrot.slane %v516_v19, 4  ;;  %v541_v24 = vadd.f32 1e-08, %v532_v20  ;;  %v543_v25 = vadd.f32 1e-08, %v536_v21 }
  0xf5   : > { %1134 = vrcp.f32 %v539_v22 }
  0xf6   : > { %vm518_vm7 = vcmp.lt.s32.totalorder %v516_v19, %v517_v23  ;;  %1136 = vrcp.f32 %v541_v24 }
  0xf7   : > { %v519_v26 = vsel %vm518_vm7, %v516_v19, %v517_v23  ;;  %1138 = vrcp.f32 %v543_v25  ;;  %v1133_v23 = vld [vmem:[%s1500_s7] sm:$0xff]  }
  0xf8   : > { %v520_v27 = vrot.slane %v519_v26, 2 }
  0xfa   : > { %vm521_vm8 = vcmp.lt.s32.totalorder %v519_v26, %v520_v27 }
  0xfb   : > { %v522_v28 = vsel %vm521_vm8, %v519_v26, %v520_v27 }
  0xfc   : > { %v523_v29 = vrot.slane %v522_v28, 1 }
  0xfe   : > { %vm524_vm9 = vcmp.lt.s32.totalorder %v522_v28, %v523_v29 }
  0xff   : > { %v1135_v30 = vpop.eup %1134  ;;  %v525_v31 = vsel %vm524_vm9, %v522_v28, %v523_v29 }
 0x100   : > { %v1137_v32 = vpop.eup %1136  ;;  %v530_v33 = vsel %vm526_vm4, %v525_v31, %v500_v63  ;;  %v533_v34 = vsel %vm527_vm5, %v525_v31, %v504_v2  ;;  %v537_v35 = vsel %vm528_vm6, %v525_v31, 4294967295 }
 0x101   : > { %v534_v36 = vsel %vm526_vm4, %v500_v63, %v533_v34  ;;  %v538_v37 = vsel %vm527_vm5, %v504_v2, %v537_v35  ;;  %v545_v38 = vadd.f32 %v1137_v32, %v1135_v30  ;;  %v1139_v39 = vpop.eup %1138  ;;  %vm551_vm10 = vcmp.eq.s32.totalorder %v1347_v6, %v530_v33  ;;  %v1132_v2 = vld [vmem:[%s1497_s4 + $0x8] sm:$0xff]  }
 0x102   : > { %vm553_vm11 = vcmp.eq.s32.totalorder %v1347_v6, %v534_v36  ;;  %vm556_vm12 = vcmp.eq.s32.totalorder %v1347_v6, %v538_v37  ;;  %v1131_v6 = vld [vmem:[%s1497_s4] sm:$0xff]  }
 0x103   : > { %v546_v40 = vadd.f32 %v1139_v39, %v545_v38  ;;  %1044 = vmatprep.mubr.msk.bf16.mxu1 %vm701_vm15, %v1131_v6 }
 0x105   : > { %1140 = vrcp.f32 %v546_v40 }
 0x10f   : > { %v1141_v41 = vpop.eup %1140 }
 0x110   : > { %v548_v42 = vmul.f32 %v1141_v41, %v1135_v30  ;;  %v549_v43 = vmul.f32 %v1141_v41, %v1137_v32  ;;  %v550_v44 = vmul.f32 %v1141_v41, %v1139_v39 }
 0x112   : > { %v552_v45 = vsel %vm551_vm10, %v548_v42, 0.0  ;;  %v554_v46 = vsel %vm553_vm11, %v549_v43, 0.0  ;;  %v557_v47 = vsel %vm556_vm12, %v550_v44, 0.0 }
 0x113   : > { %v555_v48 = vadd.f32 %v554_v46, %v552_v45 }
 0x115   : > { %v558_v49 = vadd.f32 %v557_v47, %v555_v48 }
 0x117   : > { %v561_v51 = vpack.c.bf16 %v558_v49, %v558_v49 }
 0x119   : > { %v568_v53 = vsel %vm566_vm13, %v561_v51, 0 }
 0x11a   : > { %1031 = vmatpush3.bf16.msra.mxu0 %v568_v53 }
 0x11b   : > { %1048 = vmatprep.subr.bf16.mxu0 %v1225_v4 }
 0x11d   : > { %1033 = vmatmul.mubr.msk.bf16.vlgmr.msra.gmra.mrb[0].mxu0 %vm562_vm14, %v560_v52 }
 0x11e   : > { %1052 = vmatprep.mubr.msk.bf16.mxu0 %vm1226_vm0, %v1225_v4  ;;  %vm708_vm0 = vcmask 1042432  }
 0x155   : > { %v768_v3 = vpop.permute.xlu1 %767 }
 0x159   : > { %v773_v5 = vpop.permute.xlu1 %772  ;;  %v778_v7 = vpop.permute.xlu0 %777 }
 0x15d   : > { %v783_v12 = vpop.permute.xlu1 %782  ;;  %v807_v28 = vpop.permute.xlu0 %806 }
 0x161   : > { %v802_v24 = vpop.permute.xlu1 %801 }
 0x1f0   : > { %v604_v60 = vpop.f32.mrb[0].mxu0 }
 0x1f1   : > { %v614_v61 = vpack.c.bf16 %v604_v60, %v604_v60  ;;  %v1034_v62 = vpop.f32.mrb[1].mxu0 }
 0x1f2   : > { %v607_v63 = vpop.f32.mrb[2].mxu0 }
 0x1f3   : > { %v710_v0 = vsel %vm708_vm0, %v614_v61, 0  ;;  %v1035_v1 = vpop.f32.mrb[3].mxu0  ;;  %1061 = vmatprep.subr.msk.bf16.mxu1 %vm708_vm0, %v614_v61 }
 0x1f4   : > { %1043 = vmatpush3.bf16.msra.mxu1 %v710_v0 }
 0x1f7   : > { %1045 = vmatmul.mubr.msk.bf16.vlgmr.msra.gmra.mrb[0].mxu1 %vm701_vm15, %v1132_v2 }
 0x2ca   : > { %v1046_v8 = vpop.f32.mrb[0].mxu1 }
 0x2cb   : > { %v787_v9 = vadd.f32 %v1046_v8, %v778_v7  ;;  %v746_v10 = vpop.f32.mrb[1].mxu1 }
 0x2cc   : > { %v785_v11 = vadd.f32 %v768_v3, %v746_v10  ;;  %v1047_v13 = vpop.f32.mrb[2].mxu1 }
 0x2cd   : > { %v788_v14 = vadd.f32 %v1047_v13, %v783_v12  ;;  %v749_v15 = vpop.f32.mrb[3].mxu1  ;;  %v791_v17 = vmax.f32 %v787_v9, 0.0 }
 0x2ce   : > { %v786_v16 = vadd.f32 %v773_v5, %v749_v15  ;;  %v789_v19 = vmax.f32 %v785_v11, 0.0 }
 0x2cf   : > { %v792_v18 = vmax.f32 %v788_v14, 0.0 }
 0x2d0   : > { %v790_v20 = vmax.f32 %v786_v16, 0.0 }
 0x2d1   : > { %v796_v21 = vpack.c.bf16 %v792_v18, %v791_v17 }
 0x2d2   : > { %v795_v22 = vpack.c.bf16 %v790_v20, %v789_v19 }
 0x2d4   : > { %1049 = vmatpush3.bf16.msra.mxu0 %v795_v22 }
 0x2d5   : > { %1050 = vmatprep.subr.bf16.mxu0 %v1225_v4 }
 0x2d8   : > { %1051 = vmatpush3.bf16.msra.mxu0 %v796_v21 }
 0x2db   : > { %1053 = vmatmul.mubr.msk.bf16.vlgmr.msra.gmra.mrb[4].mxu0 %vm814_vm1, %v1133_v23 }
 0x3ae   : > { %v852_v25 = vpop.f32.mrb[4].mxu0 }
 0x3af   : > { %v853_v26 = vadd.f32 %v852_v25, %v802_v24  ;;  %v1054_v27 = vpop.f32.mrb[5].mxu0 }
 0x3b0   : > { %v855_v29 = vpop.f32.mrb[6].mxu0 }
 0x3b1   : > { %v859_v4 = vmax.f32 %v853_v26, 0.0  ;;  %v856_v30 = vadd.f32 %v855_v29, %v807_v28  ;;  %v1055_v31 = vpop.f32.mrb[7].mxu0 }
 0x3b3   : > { %861 = vst.msk [vmem:[%s392_s16] sm:$0xff] %vm453_vm3, %v859_v4  ;;  %v860_v32 = vmax.f32 %v856_v30, 0.0 }
 0x3b5   : > { %862 = vst.msk [vmem:[%s392_s16 + $0x8] sm:$0xff] %vm453_vm3, %v860_v32 }
 0x3b6   : > { %1155 = shalt.err (!%p1152_p5)
}
 0x3b7   : > { %s1156_s15 = scalar_lea.hbm %s1444_s25, 256  ;;  %s1160_s20 = scalar_lea.hbm %s1502_s9, 512 }
 0x3b8   : > { %p1157_p6 = scmp.ne.s32.totalorder %s1444_s25, %s1156_s15  ;;  %p1161_p10 = scmp.lt.u32.totalorder %s1444_s25, %s1502_s9 }
 0x3b9   : > { %p1162_p11 = scmp.lt.u32.totalorder %s1160_s20, %s1156_s15  ;;  %p1164_p13 = scmp.lt.u32.totalorder %s1156_s15, %s1444_s25 }
 0x3ba   : > { %p1158_p7 = pnand %p1157_p6, %p1320_p4 }
 0x3bb   : > { %p1163_p12 = por %p1162_p11, %p1161_p10 }
 0x3bc   : > { %p1159_p9 = pneg %p1158_p7 }
 0x3bd   : > { %p1165_p0 = por %p1164_p13, %p1163_p12 }
 0x3bf   : > { %p1166_p1 = pnand %p1165_p0, %p1159_p9 }
 0x3c1   : > { %1169 = shalt.err (!%p1166_p1)
}
 0x3c2   : > { %s1228_s12 = smov 128   ;;  %s1229_s29 = smov 8  }
 0x3c3   : > { %1062 = dma.vmem_to_hbm [thread:$0]  (%p1320_p4), %s1438_s18, 256, %s1444_s25, %s1447_s26, %s1228_s12, %s1228_s12, %s1229_s29  }
 0x3c4 PF: > { %p1068_p2 = scmp.ge.s32.totalorder %s1220_s14, 2  ;;  %s893_s28 = sand.u32 1, %s1200_s30  }
 0x3c5   : > { %s894_s15 = scalar_lea.sflag [#allocation3], %s893_s28 }
 0x3c6   : > { %p1065_p3 = pnand %p1068_p2, %p1327_p8 }
 0x3c8   : > { %1195 = dma.done.wait (!%p1065_p3), %s894_s15, 256  }
 0x3c9   : > { %1197 = vsyncadd (!%p1065_p3), %s894_s15, 4294967040  ;;  %s22_s14 = sadd.s32 1, %s1220_s14   ;;  %s1505_s30 = smov %s1204_s10 }
 0x3ca   : > { %p19_p5 = scmp.ge.s32.totalorder %s22_s14, 4   ;;  %s1506_s10 = smov %s1208_s11 }
 0x3cb   : > { %s1507_s11 = smov %s1333_s22  ;;  %s1508_s12 = smov %s1216_s13 }
 0x3cc   : > { %s1509_s13 = smov %s1511_s17  ;;  %21 = sbr.rel (!%p19_p5) target bundleno = 4 (0x4), region = 100 }
 0x3d3   :  { %899 = vsyncpa [#allocation3], 1 }
 0x3d4   :  { %901 = vsyncpa [#allocation3 + $0x1], 1 }

</bundles_post_ra>
